<compile_context>
chip_gen: v7x
topology: tpu7x:2x2x1
jax: 0.10.0
libtpu: 0.0.40
codegen_flags: <defaults>
</compile_context>

<pallas_src>
import jax
import jax.numpy as jnp
from jax.experimental import pallas as pl
from jax.experimental.pallas import tpu as pltpu


_LANE = 128


def _linear_kernel(x_ref, w_ref, b_ref, o_ref, acc_ref):
    # x_ref: (bm, dk) native dtype     w_ref: (dk, 1) same dtype
    # b_ref: (1,) f32 in SMEM          o_ref: (bm, 1) f32
    # acc_ref: (bm, 1) f32 VMEM scratch, resident across the K axis
    k = pl.program_id(1)

    @pl.when(k == 0)
    def _():
        acc_ref[...] = jnp.zeros_like(acc_ref)

    # Plain (bm, dk) @ (dk, 1): standard MXU form, no transpose of the x tile.
    acc_ref[...] += jnp.dot(x_ref[...], w_ref[...],
                            preferred_element_type=jnp.float32)

    @pl.when(k == pl.num_programs(1) - 1)
    def _():
        o_ref[...] = acc_ref[...] + b_ref[0]


def _round_up(x, m):
    return ((x + m - 1) // m) * m


def _choose_tiles(B, D, itemsize):
    """Pick (bm, dk): batch-tile rows and feature-tile width.

    Tiles target ~3 MiB of x per grid step (amortizes the ~0.35us/step
    overhead; measured 86-90% of HBM roofline) and are capped at 8 MiB so a
    double-buffered input stream stays inside the 32 MiB scoped-VMEM budget
    we request (v7x has 64 MiB physical per TC).
    """
    target_bytes = 3 * 1024 * 1024
    max_tile_bytes = 8 * 1024 * 1024
    min_bm_before_split = 512

    hbm_row = max(1, D * itemsize)                      # HBM bytes per row
    vmem_row = max(1, _round_up(D, _LANE) * itemsize)   # lane-padded VMEM bytes

    bm = _round_up(max(1, target_bytes // hbm_row), _LANE)
    bm = max(_LANE, min(bm, _round_up(B, _LANE)))
    while bm > _LANE and bm * vmem_row > max_tile_bytes:
        bm = max(_LANE, (bm // 2 // _LANE) * _LANE)

    dk = D
    # Very large D: keep per-step DMA chunky by blocking the feature axis
    # instead of shrinking bm.  Only when a 128-multiple divisor of D exists,
    # so K-tail tiles never contain garbage lanes.
    if bm < min_bm_before_split and D % _LANE == 0 and D > _LANE:
        bm_t = max(_LANE, min(_round_up(B, _LANE), min_bm_before_split))
        dk_cap = max(_LANE, (max_tile_bytes // (bm_t * itemsize)) // _LANE * _LANE)
        best = None
        for nb in range(1, D // _LANE + 1):
            cand = nb * _LANE
            if cand > dk_cap:
                break
            if D % cand == 0:
                best = cand
        if best is not None:
            bm, dk = bm_t, best
    return bm, dk


def random_forest_forward(x, weight, bias, *, bm=None, allow_fallback=True):
    """Forward pass of RandomForest (a single Linear(input_dim, 1)).

    x:      (B, D)
    weight: (1, D)   (PyTorch nn.Linear weight layout)
    bias:   (1,)
    returns (B, 1) float32
    """
    B, D = x.shape

    # Native-dtype streaming: only up-cast if x is not a TPU-friendly float.
    if x.dtype not in (jnp.float32, jnp.bfloat16, jnp.float16):
        x = x.astype(jnp.float32)
    itemsize = x.dtype.itemsize

    # Tiny problems: pallas_call launch/pipeline overhead dominates; a plain
    # XLA dot is strictly faster there.
    if allow_fallback and bm is None and B * D * itemsize < 2 * 1024 * 1024:
        return (x.astype(jnp.float32)
                @ weight.reshape(D, 1).astype(jnp.float32)
                + bias.reshape(1).astype(jnp.float32))

    if bm is None:
        bm, dk = _choose_tiles(B, D, itemsize)
    else:
        # Keep bm a multiple of 128 so output stores stay lane-aligned.
        bm = max(_LANE, (int(bm) // _LANE) * _LANE)
        dk = D

    w_col = weight.reshape(D, 1).astype(x.dtype)   # (D, 1) weight column
    b1 = bias.reshape(1).astype(jnp.float32)       # SMEM scalar

    num_tiles = pl.cdiv(B, bm)   # ragged tail handled by Pallas boundary
    k_tiles = D // dk            # clipping -- no jnp.pad copy of x in HBM

    vmem_limit = int(max(32 * 1024 * 1024,
                         2 * bm * _round_up(dk, _LANE) * itemsize
                         + 4 * 1024 * 1024))

    out = pl.pallas_call(
        _linear_kernel,
        out_shape=jax.ShapeDtypeStruct((B, 1), jnp.float32),
        grid_spec=pltpu.PrefetchScalarGridSpec(
            num_scalar_prefetch=0,
            grid=(num_tiles, k_tiles),
            in_specs=[
                pl.BlockSpec((bm, dk), lambda i, k: (i, k)),           # x tile
                pl.BlockSpec((dk, 1), lambda i, k: (k, 0)),            # weight
                pl.BlockSpec(memory_space=pltpu.MemorySpace.SMEM),     # bias
            ],
            out_specs=pl.BlockSpec((bm, 1), lambda i, k: (i, 0)),
            scratch_shapes=[pltpu.VMEM((bm, 1), jnp.float32)],
        ),
        compiler_params=pltpu.CompilerParams(
            dimension_semantics=("parallel", "arbitrary"),
            vmem_limit_bytes=vmem_limit),
    )(x, w_col, b1)

    return out


if __name__ == "__main__":
    key = jax.random.PRNGKey(0)
    kx, kw, kb, kx2 = jax.random.split(key, 4)

    batch, input_dim = 8, 32

    # Parameters with the same shapes as nn.Linear(input_dim, 1),
    # PyTorch-style uniform(-1/sqrt(D), 1/sqrt(D)) init.
    bound = 1.0 / jnp.sqrt(jnp.float32(input_dim))
    weight = jax.random.uniform(kw, (1, input_dim), jnp.float32, -bound, bound)
    bias = jax.random.uniform(kb, (1,), jnp.float32, -bound, bound)

    x = jax.random.normal(kx, (batch, input_dim), jnp.float32)

    # Force the Pallas path (the wrapper would otherwise take the XLA
    # small-problem fallback for an 8x32 input).
    out = jax.block_until_ready(
        random_forest_forward(x, weight, bias, allow_fallback=False))
    ref = x @ weight.T + bias
    assert out.shape == (batch, 1)
    assert jnp.allclose(out, ref, atol=1e-5, rtol=1e-5)

    # Ragged batch + multi-tile grid: exercises Pallas tail-tile clipping
    # (no jnp.pad copy of x in HBM).
    x2 = jax.random.normal(kx2, (300, input_dim), jnp.float32)
    out2 = jax.block_until_ready(
        random_forest_forward(x2, weight, bias, bm=128))
    ref2 = x2 @ weight.T + bias
    assert out2.shape == (300, 1)
    assert jnp.allclose(out2, ref2, atol=1e-5, rtol=1e-5)

    # Small-problem fallback path (plain XLA dot).
    out3 = jax.block_until_ready(random_forest_forward(x, weight, bias))
    assert jnp.allclose(out3, ref, atol=1e-5, rtol=1e-5)

    print("KERNEL_OK")
</pallas_src>

<mosaic_0001>
module attributes {stable_mosaic.version = 11 : i64} {
  func.func @_linear_kernel(%arg0: i32, %arg1: i32, %arg2: memref<128x32xf32, #tpu.memory_space<vmem>>, %arg3: memref<32x1xf32, #tpu.memory_space<vmem>>, %arg4: memref<1xf32, #tpu.memory_space<smem>>, %arg5: memref<128x1xf32, #tpu.memory_space<vmem>>, %arg6: memref<128x1xf32, #tpu.memory_space<vmem>>) attributes {dimension_semantics = [#tpu.dimension_semantics<parallel>, #tpu.dimension_semantics<arbitrary>], iteration_bounds = array<i64: 1, 1>, scalar_prefetch = 0 : i64, scratch_operands = 1 : i64, tpu.core_type = #tpu.core_type<tc>, window_params = [{transform_indices = @transform_0, window_bounds = array<i64: 128, 32>}, {transform_indices = @transform_1, window_bounds = array<i64: 32, 1>}, {transform_indices = @transform_2, window_bounds = array<i64: 1>}, {transform_indices = @transform_3, window_bounds = array<i64: 128, 1>}]} {
    %c0_i32 = arith.constant 0 : i32
    %0 = arith.cmpi eq, %arg1, %c0_i32 : i32
    %1 = arith.extui %0 : i1 to i32
    %c0_i32_0 = arith.constant 0 : i32
    %2 = arith.cmpi ne, %1, %c0_i32_0 : i32
    scf.if %2 {
      %cst_10 = arith.constant 0.000000e+00 : f32
      %12 = vector.broadcast %cst_10 : f32 to vector<128x1xf32>
      %c0_11 = arith.constant 0 : index
      %c0_12 = arith.constant 0 : index
      %13 = vector.load %arg6[%c0_11, %c0_12] : memref<128x1xf32, #tpu.memory_space<vmem>>, vector<128x1xf32>
      tpu.vector_store %arg6[%c0_11, %c0_12], %12 {strides = array<i32>} : memref<128x1xf32, #tpu.memory_space<vmem>>, vector<128x1xf32>,
    } else {
    }
    %c0 = arith.constant 0 : index
    %c0_1 = arith.constant 0 : index
    %3 = vector.load %arg6[%c0, %c0_1] : memref<128x1xf32, #tpu.memory_space<vmem>>, vector<128x1xf32>
    %c0_2 = arith.constant 0 : index
    %c0_3 = arith.constant 0 : index
    %4 = vector.load %arg2[%c0_2, %c0_3] : memref<128x32xf32, #tpu.memory_space<vmem>>, vector<128x32xf32>
    %c0_4 = arith.constant 0 : index
    %c0_5 = arith.constant 0 : index
    %5 = vector.load %arg3[%c0_4, %c0_5] : memref<32x1xf32, #tpu.memory_space<vmem>>, vector<32x1xf32>
    %cst = arith.constant dense<0.000000e+00> : vector<128x1xf32>
    %6 = tpu.matmul %4, %5, %cst {dimension_numbers = #tpu.dot_dimension_numbers<[1], [0], [0], [1], [0, 0, 1, 1], [], []>} : vector<128x32xf32>, vector<32x1xf32>, vector<128x1xf32> -> vector<128x1xf32>
    %7 = arith.addf %3, %6 : vector<128x1xf32>
    %c0_6 = arith.constant 0 : index
    %c0_7 = arith.constant 0 : index
    %8 = vector.load %arg6[%c0_6, %c0_7] : memref<128x1xf32, #tpu.memory_space<vmem>>, vector<128x1xf32>
    tpu.vector_store %arg6[%c0_6, %c0_7], %7 {strides = array<i32>} : memref<128x1xf32, #tpu.memory_space<vmem>>, vector<128x1xf32>,
    %c0_i32_8 = arith.constant 0 : i32
    %9 = arith.cmpi eq, %arg1, %c0_i32_8 : i32
    %10 = arith.extui %9 : i1 to i32
    %c0_i32_9 = arith.constant 0 : i32
    %11 = arith.cmpi ne, %10, %c0_i32_9 : i32
    scf.if %11 {
      %c0_10 = arith.constant 0 : index
      %c0_11 = arith.constant 0 : index
      %12 = vector.load %arg6[%c0_10, %c0_11] : memref<128x1xf32, #tpu.memory_space<vmem>>, vector<128x1xf32>
      %c0_12 = arith.constant 0 : index
      %13 = memref.load %arg4[%c0_12] : memref<1xf32, #tpu.memory_space<smem>>
      %14 = vector.broadcast %13 : f32 to vector<128x1xf32>
      %15 = arith.addf %12, %14 : vector<128x1xf32>
      %c0_13 = arith.constant 0 : index
      %c0_14 = arith.constant 0 : index
      %16 = vector.load %arg5[%c0_13, %c0_14] : memref<128x1xf32, #tpu.memory_space<vmem>>, vector<128x1xf32>
      tpu.vector_store %arg5[%c0_13, %c0_14], %15 {strides = array<i32>} : memref<128x1xf32, #tpu.memory_space<vmem>>, vector<128x1xf32>,
    } else {
    }
    return
  }
  func.func @transform_0(%arg0: i32, %arg1: i32) -> (i32, i32) {
    %c0_i32 = arith.constant 0 : i32
    return %arg0, %arg1 : i32, i32
  }
  func.func @transform_1(%arg0: i32, %arg1: i32) -> (i32, i32) {
    %c0_i32 = arith.constant 0 : i32
    %c0_i32_0 = arith.constant 0 : i32
    return %arg1, %c0_i32 : i32, i32
  }
  func.func @transform_2(%arg0: i32, %arg1: i32) -> i32 {
    %c0_i32 = arith.constant 0 : i32
    %c0_i32_0 = arith.constant 0 : i32
    return %c0_i32 : i32
  }
  func.func @transform_3(%arg0: i32, %arg1: i32) -> (i32, i32) {
    %c0_i32 = arith.constant 0 : i32
    %c0_i32_0 = arith.constant 0 : i32
    return %arg0, %c0_i32 : i32, i32
  }
}

</mosaic_0001>

<bundles_post_ra>
// kernel: tpu_custom_call.1
= control target key start
LH: loop header
LB: loop body
LE: loop exit
PB: predicated region body
PF: predicated region fallthrough
CT: control target
= control target key end

     0   :  { %vm72_vm0 = vcmask 261120   ;;  %vm19_vm1 = vcmask 7168   ;;  %v473_v7 = vmov 0.0   ;;  %s609_s0 = inlined_call_operand.vmem [shape: f32[8,32], index: 0, kind: input, shape index: {}]   ;;  %s610_s1 = inlined_call_operand.vmem [shape: f32[32,1], index: 1, kind: input, shape index: {}]   ;;  %s611_s2 = inlined_call_operand.<no memory space> [shape: f32[1], index: 2, kind: input, shape index: {}]   ;;  %s612_s3 = inlined_call_operand.vmem [shape: f32[8,1], index: 3, kind: output, shape index: {}]  }
   0x1   :  { %v68_v0 = vld [vmem:[%s610_s1] sm:$0xff]  ;;  %v69_v1 = vld [vmem:[%s610_s1 + $0x8] sm:$0xff]  ;;  %v70_v2 = vld [vmem:[%s610_s1 + $0x10] sm:$0xff]  ;;  %21 = vst.msk [vmem:[#allocation2 + $0x8] sm:$0xff] %vm19_vm1, %v473_v7  ;;  %v319_v51 = vstv %s611_s2 }
   0x2   :  { %v460_v3 = vpack.c.bf16 %v69_v1, %v68_v0  ;;  %v71_v4 = vld [vmem:[%s610_s1 + $0x18] sm:$0xff]  ;;  %v52_v5 = vld [vmem:[%s609_s0] sm:$0xff]  ;;  %20 = vst.msk [vmem:[#allocation2] sm:$0xff] %vm19_vm1, %v473_v7  ;;  %22 = vst.msk [vmem:[#allocation2 + $0x10] sm:$0xff] %vm19_vm1, %v473_v7 }
   0x3   :  { %v60_v6 = vld [vmem:[%s609_s0 + $0x40] sm:$0xff]  ;;  %23 = vst.msk [vmem:[#allocation2 + $0x18] sm:$0xff] %vm19_vm1, %v473_v7  ;;  %24 = vst.msk [vmem:[#allocation2 + $0x20] sm:$0xff] %vm19_vm1, %v473_v7  ;;  %v464_v8 = vpack.c.bf16 %v71_v4, %v70_v2  ;;  %436 = vmatprep.mubr.msk.f32.mxu0 %vm72_vm0, %v52_v5  ;;  %v53_v9 = vld [vmem:[%s609_s0 + $0x8] sm:$0xff] }
   0x4   :  { %25 = vst.msk [vmem:[#allocation2 + $0x28] sm:$0xff] %vm19_vm1, %v473_v7  ;;  %26 = vst.msk [vmem:[#allocation2 + $0x30] sm:$0xff] %vm19_vm1, %v473_v7  ;;  %448 = vmatprep.mubr.msk.f32.mxu1 %vm72_vm0, %v60_v6  ;;  %461 = vmatprep.subr.bf16.mxu0 %v460_v3  ;;  %v61_v10 = vld [vmem:[%s609_s0 + $0x48] sm:$0xff]  ;;  %v54_v11 = vld [vmem:[%s609_s0 + $0x10] sm:$0xff] }
   0x5   :  { %27 = vst.msk [vmem:[#allocation2 + $0x38] sm:$0xff] %vm19_vm1, %v473_v7  ;;  %28 = vst.msk [vmem:[#allocation2 + $0x40] sm:$0xff] %vm19_vm1, %v473_v7  ;;  %468 = vmatprep.subr.bf16.mxu1 %v460_v3  ;;  %463 = vmatpush3.bf16.msra.mxu0 %v460_v3  ;;  %v62_v12 = vld [vmem:[%s609_s0 + $0x50] sm:$0xff]  ;;  %v55_v13 = vld [vmem:[%s609_s0 + $0x18] sm:$0xff] }
   0x6   :  { %29 = vst.msk [vmem:[#allocation2 + $0x48] sm:$0xff] %vm19_vm1, %v473_v7  ;;  %30 = vst.msk [vmem:[#allocation2 + $0x50] sm:$0xff] %vm19_vm1, %v473_v7  ;;  %470 = vmatpush3.bf16.msra.mxu1 %v460_v3  ;;  %465 = vmatprep.subr.bf16.mxu0 %v464_v8  ;;  %v63_v14 = vld [vmem:[%s609_s0 + $0x58] sm:$0xff]  ;;  %v56_v15 = vld [vmem:[%s609_s0 + $0x20] sm:$0xff] }
   0x7   :  { %31 = vst.msk [vmem:[#allocation2 + $0x58] sm:$0xff] %vm19_vm1, %v473_v7  ;;  %32 = vst.msk [vmem:[#allocation2 + $0x60] sm:$0xff] %vm19_vm1, %v473_v7  ;;  %469 = vmatprep.subr.bf16.mxu1 %v464_v8  ;;  %v64_v16 = vld [vmem:[%s609_s0 + $0x60] sm:$0xff]  ;;  %v57_v17 = vld [vmem:[%s609_s0 + $0x28] sm:$0xff] }
   0x8   :  { %33 = vst.msk [vmem:[#allocation2 + $0x68] sm:$0xff] %vm19_vm1, %v473_v7  ;;  %34 = vst.msk [vmem:[#allocation2 + $0x70] sm:$0xff] %vm19_vm1, %v473_v7  ;;  %v65_v18 = vld [vmem:[%s609_s0 + $0x68] sm:$0xff]  ;;  %v58_v19 = vld [vmem:[%s609_s0 + $0x30] sm:$0xff] }
   0x9   :  { %35 = vst.msk [vmem:[#allocation2 + $0x78] sm:$0xff] %vm19_vm1, %v473_v7  ;;  %467 = vmatpush3.bf16.msra.mxu0 %v464_v8  ;;  %v66_v20 = vld [vmem:[%s609_s0 + $0x70] sm:$0xff]  ;;  %v59_v21 = vld [vmem:[%s609_s0 + $0x38] sm:$0xff]  ;;  %v37_v23 = vld [vmem:[#allocation2 + $0x8] sm:$0xff] }
   0xa   :  { %471 = vmatpush3.bf16.msra.mxu1 %v464_v8  ;;  %v67_v22 = vld [vmem:[%s609_s0 + $0x78] sm:$0xff]  ;;  %v36_v25 = vld [vmem:[#allocation2] sm:$0xff]  ;;  %v38_v37 = vld [vmem:[#allocation2 + $0x10] sm:$0xff] }
   0xb   :  { %v39_v35 = vld [vmem:[#allocation2 + $0x18] sm:$0xff]  ;;  %v41_v47 = vld [vmem:[#allocation2 + $0x28] sm:$0xff]  ;;  %v40_v49 = vld [vmem:[#allocation2 + $0x20] sm:$0xff] }
   0xc   :  { %437 = vmatmul.mubr.msk.f32.vlgmr.msra.gmra.mrb[0].mxu0 %vm72_vm0, %v53_v9  ;;  %v44_v26 = vld [vmem:[#allocation2 + $0x40] sm:$0xff]  ;;  %v43_v58 = vld [vmem:[#allocation2 + $0x38] sm:$0xff]  ;;  %v42_v62 = vld [vmem:[#allocation2 + $0x30] sm:$0xff] }
   0xd   :  { %449 = vmatmul.mubr.msk.f32.vlgmr.msra.gmra.mrb[0].mxu1 %vm72_vm0, %v61_v10  ;;  %439 = vmatprep.mubr.msk.f32.mxu0 %vm72_vm0, %v54_v11  ;;  %v45_v24 = vld [vmem:[#allocation2 + $0x48] sm:$0xff]  ;;  %v46_v38 = vld [vmem:[#allocation2 + $0x50] sm:$0xff] }
   0xe   :  { %451 = vmatprep.mubr.msk.f32.mxu1 %vm72_vm0, %v62_v12  ;;  %v47_v36 = vld [vmem:[#allocation2 + $0x58] sm:$0xff]  ;;  %v48_v50 = vld [vmem:[#allocation2 + $0x60] sm:$0xff] }
   0xf   :  { %v49_v48 = vld [vmem:[#allocation2 + $0x68] sm:$0xff]  ;;  %v50_v0 = vld [vmem:[#allocation2 + $0x70] sm:$0xff] }
  0x10   :  { %440 = vmatmul.mubr.msk.f32.gmra.mrb[2].mxu0 %vm72_vm0, %v55_v13  ;;  %v51_v59 = vld [vmem:[#allocation2 + $0x78] sm:$0xff] }
  0x11   :  { %452 = vmatmul.mubr.msk.f32.gmra.mrb[2].mxu1 %vm72_vm0, %v63_v14  ;;  %442 = vmatprep.mubr.msk.f32.mxu0 %vm72_vm0, %v56_v15 }
  0x12   :  { %454 = vmatprep.mubr.msk.f32.mxu1 %vm72_vm0, %v64_v16 }
  0x14   :  { %443 = vmatmul.mubr.msk.f32.gmra.mrb[4].mxu0 %vm72_vm0, %v57_v17 }
  0x15   :  { %455 = vmatmul.mubr.msk.f32.gmra.mrb[4].mxu1 %vm72_vm0, %v65_v18  ;;  %445 = vmatprep.mubr.msk.f32.mxu0 %vm72_vm0, %v58_v19 }
  0x16   :  { %457 = vmatprep.mubr.msk.f32.mxu1 %vm72_vm0, %v66_v20 }
  0x18   :  { %446 = vmatmul.mubr.msk.f32.gmra.mrb[6].mxu0 %vm72_vm0, %v59_v21 }
  0x19   :  { %458 = vmatmul.mubr.msk.f32.gmra.mrb[6].mxu1 %vm72_vm0, %v67_v22 }
  0xdf   :  { %v438_v27 = vpop.f32.mrb[0].mxu0 }
  0xe0   :  { %v450_v28 = vpop.f32.mrb[0].mxu1  ;;  %v267_v29 = vadd.f32 %v438_v27, %v37_v23  ;;  %v187_v31 = vpop.f32.mrb[1].mxu0 }
  0xe1   :  { %v275_v30 = vadd.f32 %v450_v28, %v45_v24  ;;  %v227_v32 = vpop.f32.mrb[1].mxu1  ;;  %v266_v33 = vadd.f32 %v187_v31, %v36_v25 }
  0xe2   :  { %v274_v34 = vadd.f32 %v227_v32, %v44_v26  ;;  %284 = vst.msk [vmem:[#allocation2 + $0x8] sm:$0xff] %vm19_vm1, %v267_v29 }
  0xe3   :  { %292 = vst.msk [vmem:[#allocation2 + $0x48] sm:$0xff] %vm19_vm1, %v275_v30  ;;  %283 = vst.msk [vmem:[#allocation2] sm:$0xff] %vm19_vm1, %v266_v33  ;;  %v441_v39 = vpop.f32.mrb[2].mxu0 }
  0xe4   :  { %291 = vst.msk [vmem:[#allocation2 + $0x40] sm:$0xff] %vm19_vm1, %v274_v34  ;;  %v453_v40 = vpop.f32.mrb[2].mxu1  ;;  %v269_v41 = vadd.f32 %v441_v39, %v39_v35  ;;  %v197_v43 = vpop.f32.mrb[3].mxu0 }
  0xe5   :  { %v277_v42 = vadd.f32 %v453_v40, %v47_v36  ;;  %v237_v44 = vpop.f32.mrb[3].mxu1  ;;  %v268_v45 = vadd.f32 %v197_v43, %v38_v37 }
  0xe6   :  { %v276_v46 = vadd.f32 %v237_v44, %v46_v38  ;;  %286 = vst.msk [vmem:[#allocation2 + $0x18] sm:$0xff] %vm19_vm1, %v269_v41 }
  0xe7   :  { %294 = vst.msk [vmem:[#allocation2 + $0x58] sm:$0xff] %vm19_vm1, %v277_v42  ;;  %285 = vst.msk [vmem:[#allocation2 + $0x10] sm:$0xff] %vm19_vm1, %v268_v45  ;;  %v444_v52 = vpop.f32.mrb[4].mxu0 }
  0xe8   :  { %293 = vst.msk [vmem:[#allocation2 + $0x50] sm:$0xff] %vm19_vm1, %v276_v46  ;;  %v456_v53 = vpop.f32.mrb[4].mxu1  ;;  %v271_v54 = vadd.f32 %v444_v52, %v41_v47  ;;  %v207_v56 = vpop.f32.mrb[5].mxu0 }
  0xe9   :  { %v279_v55 = vadd.f32 %v456_v53, %v49_v48  ;;  %v247_v57 = vpop.f32.mrb[5].mxu1  ;;  %v270_v60 = vadd.f32 %v207_v56, %v40_v49 }
  0xea   :  { %v278_v61 = vadd.f32 %v247_v57, %v48_v50  ;;  %v302_v63 = vld [vmem:[#allocation2] sm:$0xff]  ;;  %288 = vst.msk [vmem:[#allocation2 + $0x28] sm:$0xff] %vm19_vm1, %v271_v54 }
  0xeb   :  { %296 = vst.msk [vmem:[#allocation2 + $0x68] sm:$0xff] %vm19_vm1, %v279_v55  ;;  %v320_v1 = vadd.f32 %v319_v51, %v302_v63  ;;  %287 = vst.msk [vmem:[#allocation2 + $0x20] sm:$0xff] %vm19_vm1, %v270_v60  ;;  %v447_v2 = vpop.f32.mrb[6].mxu0 }
  0xec   :  { %295 = vst.msk [vmem:[#allocation2 + $0x60] sm:$0xff] %vm19_vm1, %v278_v61  ;;  %v459_v3 = vpop.f32.mrb[6].mxu1  ;;  %v273_v4 = vadd.f32 %v447_v2, %v43_v58  ;;  %v217_v6 = vpop.f32.mrb[7].mxu0 }
  0xed   :  { %v281_v5 = vadd.f32 %v459_v3, %v51_v59  ;;  %v257_v7 = vpop.f32.mrb[7].mxu1  ;;  %336 = vst.msk [vmem:[#allocation4] sm:$0xff] %vm19_vm1, %v320_v1  ;;  %v272_v8 = vadd.f32 %v217_v6, %v42_v62 }
  0xee   :  { %v280_v9 = vadd.f32 %v257_v7, %v50_v0  ;;  %290 = vst.msk [vmem:[#allocation2 + $0x38] sm:$0xff] %vm19_vm1, %v273_v4 }
  0xef   :  { %298 = vst.msk [vmem:[#allocation2 + $0x78] sm:$0xff] %vm19_vm1, %v281_v5  ;;  %289 = vst.msk [vmem:[#allocation2 + $0x30] sm:$0xff] %vm19_vm1, %v272_v8 }
  0xf0   :  { %297 = vst.msk [vmem:[#allocation2 + $0x70] sm:$0xff] %vm19_vm1, %v280_v9 }
  0xf4   :  { %v381_v10 = vld [vmem:[#allocation4] sm:$0xff] }
  0xf5   :  { %382 = vst [vmem:[%s612_s3] sm:$0xff] %v381_v10 }

</bundles_post_ra>
